<compile_context>
chip_gen: v6e
topology: v6e:2x2x1
jax: 0.10.0
libtpu: 0.0.40
codegen_flags: <defaults>
</compile_context>

<pallas_src>
import functools

import jax
import jax.numpy as jnp
from jax.experimental import pallas as pl
from jax.experimental.pallas import tpu as pltpu

_EPS = 1e-5      # BatchNorm1d eps
_LANES = 128


def _round_up(v, m):
    return ((v + m - 1) // m) * m


# ------------------------------ fused kernel ------------------------------- #

def _fused_forward_kernel(
    nhl,                 # static: n_hidden_layers (bound via functools.partial)
    # resident inputs (constant block index -> loaded once)
    x0_ref,              # (N, Cp)    lane-padded input node features
    sdst_ref,            # (N, Et)    one-hot dst incidence (self loops appended)
    sdstT_ref,           # (Et, N)
    ssrc_ref,            # (N, Et)    one-hot src incidence
    ssrcT_ref,           # (Et, N)
    eaT_ref,             # (Ed, Et)   edge attributes, edges on the lane axis
    slm_ref,             # (1, Et)    1.0 at self-loop slots, 0 elsewhere
    mask_ref,            # (G, N, 1)  graph-membership mask for max pooling
    # per-layer parameters, streamed by the layer grid axis
    w_ref,               # (1, Cp, Cp)
    b_ref,               # (1, 1, Cp)
    w1t_ref,             # (1, H, Ed)
    b1_ref,              # (1, H, 1)
    w2t_ref,             # (1, 1, H)
    b2_ref,              # (1, 1, 1)
    # head
    linw_ref,            # (Cp, NC)
    linb_ref,            # (1, NC)
    # output (resident across the grid, written at the last step only)
    out_ref,             # (G, NC)
    # VMEM scratch (persist across grid steps)
    x_vmem,              # (N, Cp)  current node features
    psum_vmem,           # (N, Cp)  running skip sum x0 + x1 + ... + x_{b-1}
):
    l = pl.program_id(0)
    last = pl.num_programs(0) - 1

    @pl.when(l == 0)
    def _init():
        x_vmem[...] = x0_ref[...]
        psum_vmem[...] = jnp.zeros_like(psum_vmem)

    x = x_vmem[...]

    # ---- pre-activation: fresh train-mode BatchNorm (gamma=1, beta=0) + ReLU ----
    # (identity for the first conv; padded channels remain exactly zero)
    mean = jnp.mean(x, axis=0, keepdims=True)
    var = jnp.mean((x - mean) ** 2, axis=0, keepdims=True)      # biased variance
    h_bn = jnp.maximum((x - mean) * jax.lax.rsqrt(var + _EPS), 0.0)
    h = jnp.where(l == 0, x, h_bn)

    # ---- per-layer edge MLP -> sigmoid edge weights, lane-dense (1, Et) ----
    hT = jnp.maximum(
        jnp.dot(w1t_ref[0], eaT_ref[...], preferred_element_type=jnp.float32)
        + b1_ref[0], 0.0)                                       # (H, Et)
    z = jnp.dot(w2t_ref[0], hT, preferred_element_type=jnp.float32) + b2_ref[0]
    slm = slm_ref[...]
    ew = slm + (1.0 - slm) * jax.nn.sigmoid(z)                  # self-loop weight 1.0

    # ---- gcn_norm + dense adjacency, built in-kernel with MXU matmuls ----
    sdst = sdst_ref[...]
    deg = jnp.dot(ew, sdstT_ref[...], preferred_element_type=jnp.float32)    # (1, N)
    dinv = jnp.where(deg > 0.0, jax.lax.rsqrt(deg), 0.0)
    dsrc = jnp.dot(dinv, ssrc_ref[...], preferred_element_type=jnp.float32)  # (1, Et)
    ddst = jnp.dot(dinv, sdst, preferred_element_type=jnp.float32)           # (1, Et)
    norm = dsrc * ew * ddst                                                  # (1, Et)
    adj = jnp.dot(sdst * norm, ssrcT_ref[...],
                  preferred_element_type=jnp.float32)                        # (N, N)

    # ---- PDNConv: A @ (h @ W) + b ----
    hw = jnp.dot(h, w_ref[0], preferred_element_type=jnp.float32)            # (N, Cp)
    x_new = jnp.dot(adj, hw, preferred_element_type=jnp.float32) + b_ref[0]  # (N, Cp)

    # ---- dense-add skip bookkeeping (branch boundary every nhl hidden layers) ----
    psum = psum_vmem[...]
    at_boundary = jnp.logical_and(l > 0, (l % nhl) == 0)
    x_next = jnp.where(at_boundary, x_new + psum, x_new)
    psum_next = jnp.where(l == 0, x_new,
                          jnp.where(at_boundary, psum + x_next, psum))
    x_vmem[...] = x_next
    psum_vmem[...] = psum_next

    # ---- final step: x6.relu() -> global max pool -> linear head ----
    @pl.when(l == last)
    def _finish():
        xr = jnp.maximum(x_next, 0.0)                           # (N, Cp)
        # 0-sentinel masked max is exact for non-empty graphs since xr >= 0 post-ReLU.
        masked = mask_ref[...] * xr[None, :, :]                 # (G, N, Cp)
        pooled = jnp.max(masked, axis=1)                        # (G, Cp)
        # TODO(synk): train-mode dropout with p > 0 not implemented; p=0.0 is the identity.
        out_ref[...] = (jnp.dot(pooled, linw_ref[...],
                                preferred_element_type=jnp.float32)
                        + linb_ref[...])


# ------------------------------ pallas_call glue ---------------------------- #

def _const_spec(shape):
    nd = len(shape)
    return pl.BlockSpec(tuple(shape), lambda l: (0,) * nd)


def _layer_spec(shape2d):
    return pl.BlockSpec((1,) + tuple(shape2d), lambda l: (l, 0, 0))


@functools.partial(jax.jit, static_argnames=("n_hidden_layers", "num_graphs"))
def model_forward(params, x, src, dst, batch, edge_attr, dropout,
                  n_hidden_layers, num_graphs):
    del dropout  # TODO(synk): dropout p>0 in training mode not implemented (p=0 identity).
    f32 = jnp.float32
    n, f_in = x.shape
    e, e_dim = edge_attr.shape
    c = params["conv1"]["W"].shape[1]
    h_dim = params["conv1"]["w1"].shape[1]
    nc = params["lin_W"].shape[1]
    nhl = n_hidden_layers
    n_layers = 1 + 6 * nhl

    c_pad = _round_up(max(c, f_in), _LANES)      # lane-pad channels (exact no-op)
    e_real = e + n                               # edges + one self loop per node
    e_pad = _round_up(e_real, _LANES)            # lane-pad edge axis

    # ---- pad & stack per-layer parameters (layer 0 = conv1, input rows padded) ----
    def pad_w(w):
        return jnp.zeros((c_pad, c_pad), f32).at[:w.shape[0], :w.shape[1]].set(w)

    def pad_b(b):
        return jnp.zeros((1, c_pad), f32).at[:, :b.shape[1]].set(b)

    layers = [params["conv1"]] + [params["hidden"][br][i]
                                  for br in range(6) for i in range(nhl)]
    ws = jnp.stack([pad_w(p["W"]) for p in layers])        # (L, Cp, Cp)
    bs = jnp.stack([pad_b(p["b"]) for p in layers])        # (L, 1, Cp)
    w1ts = jnp.stack([p["w1"].T for p in layers])          # (L, H, Ed)
    b1s = jnp.stack([p["b1"].T for p in layers])           # (L, H, 1)
    w2ts = jnp.stack([p["w2"].T for p in layers])          # (L, 1, H)
    b2s = jnp.stack([p["b2"] for p in layers])             # (L, 1, 1)

    # ---- graph structure -> one-hot incidence matrices (self loops appended) ----
    sl = jnp.arange(n, dtype=src.dtype)
    src_f = jnp.concatenate([src, sl])
    dst_f = jnp.concatenate([dst, sl])
    node_ids = jnp.arange(n, dtype=jnp.int32)[:, None]
    s_dst = jnp.zeros((n, e_pad), f32).at[:, :e_real].set(
        (node_ids == dst_f[None, :]).astype(f32))
    s_src = jnp.zeros((n, e_pad), f32).at[:, :e_real].set(
        (node_ids == src_f[None, :]).astype(f32))

    ea_t = jnp.zeros((e_dim, e_pad), f32).at[:, :e].set(edge_attr.astype(f32).T)
    sl_mask = jnp.zeros((1, e_pad), f32).at[:, e:e_real].set(1.0)

    # ---- node features (lane-padded), pooling mask, head weights ----
    x0 = jnp.zeros((n, c_pad), f32).at[:, :f_in].set(x.astype(f32))
    mask_gn1 = (jnp.arange(num_graphs, dtype=batch.dtype)[:, None]
                == batch[None, :]).astype(f32)[:, :, None]      # (G, N, 1)
    lin_w = jnp.zeros((c_pad, nc), f32).at[:c, :].set(params["lin_W"])
    lin_b = params["lin_b"].astype(f32)

    kernel = functools.partial(_fused_forward_kernel, nhl)

    return pl.pallas_call(
        kernel,
        out_shape=jax.ShapeDtypeStruct((num_graphs, nc), f32),
        grid_spec=pltpu.PrefetchScalarGridSpec(
            num_scalar_prefetch=0,
            grid=(n_layers,),
            in_specs=[
                _const_spec((n, c_pad)),            # x0 (padded features)
                _const_spec((n, e_pad)),            # S_dst
                _const_spec((e_pad, n)),            # S_dst^T
                _const_spec((n, e_pad)),            # S_src
                _const_spec((e_pad, n)),            # S_src^T
                _const_spec((e_dim, e_pad)),        # edge_attr^T
                _const_spec((1, e_pad)),            # self-loop mask
                _const_spec((num_graphs, n, 1)),    # pooling mask
                _layer_spec((c_pad, c_pad)),        # W_l
                _layer_spec((1, c_pad)),            # b_l
                _layer_spec((h_dim, e_dim)),        # W1_l^T
                _layer_spec((h_dim, 1)),            # b1_l (column)
                _layer_spec((1, h_dim)),            # W2_l^T
                _layer_spec((1, 1)),                # b2_l
                _const_spec((c_pad, nc)),           # lin W (row-padded)
                _const_spec((1, nc)),               # lin b
            ],
            out_specs=pl.BlockSpec((num_graphs, nc), lambda l: (0, 0)),
            scratch_shapes=[pltpu.VMEM((n, c_pad), f32),
                            pltpu.VMEM((n, c_pad), f32)],
        ),
        compiler_params=pltpu.CompilerParams(
            dimension_semantics=("arbitrary",)),
    )(x0, s_dst, s_dst.T, s_src, s_src.T, ea_t, sl_mask, mask_gn1,
      ws, bs, w1ts, b1s, w2ts, b2s, lin_w, lin_b)


# ------------------------------ parameter init ------------------------------ #

def init_pdn_params(key, in_ch, out_ch, edge_dim, hidden):
    ks = jax.random.split(key, 6)
    return {
        "W":  0.1 * jax.random.normal(ks[0], (in_ch, out_ch), jnp.float32),
        "b":  0.1 * jax.random.normal(ks[1], (1, out_ch), jnp.float32),
        "w1": 0.1 * jax.random.normal(ks[2], (edge_dim, hidden), jnp.float32),
        "b1": 0.1 * jax.random.normal(ks[3], (1, hidden), jnp.float32),
        "w2": 0.1 * jax.random.normal(ks[4], (hidden, 1), jnp.float32),
        "b2": 0.1 * jax.random.normal(ks[5], (1, 1), jnp.float32),
    }


if __name__ == "__main__":
    N, F_IN, C, E_DIM, E, G, NUM_CLASSES, NHL = 16, 8, 32, 4, 32, 2, 3, 1

    key = jax.random.PRNGKey(0)
    k = jax.random.split(key, 8)
    x = jax.random.normal(k[0], (N, F_IN), jnp.float32)
    edge_attr = jax.random.normal(k[1], (E, E_DIM), jnp.float32)
    src = jax.random.randint(k[2], (E,), 0, N, dtype=jnp.int32)
    # guarantee no pre-existing self loops (matches add_remaining_self_loops semantics)
    dst = (src + 1 + jax.random.randint(k[3], (E,), 0, N - 1, dtype=jnp.int32)) % N
    batch = jnp.concatenate([jnp.zeros((N // 2,), jnp.int32),
                             jnp.ones((N - N // 2,), jnp.int32)])

    pkeys = jax.random.split(k[4], 1 + 6 * NHL + 1)
    params = {"conv1": init_pdn_params(pkeys[0], F_IN, C, E_DIM, E_DIM)}
    hidden = []
    idx = 1
    for b in range(6):
        branch_layers = []
        for i in range(NHL):
            branch_layers.append(init_pdn_params(pkeys[idx], C, C, E_DIM, E_DIM))
            idx += 1
        hidden.append(branch_layers)
    params["hidden"] = hidden
    lk = jax.random.split(pkeys[idx], 2)
    params["lin_W"] = 0.1 * jax.random.normal(lk[0], (C, NUM_CLASSES), jnp.float32)
    params["lin_b"] = 0.1 * jax.random.normal(lk[1], (1, NUM_CLASSES), jnp.float32)

    out = model_forward(params, x, src, dst, batch, edge_attr, 0.0,
                        n_hidden_layers=NHL, num_graphs=G)
    out = jax.block_until_ready(out)
    assert out.shape == (G, NUM_CLASSES) and out.dtype == jnp.float32
    assert bool(jnp.all(jnp.isfinite(out)))
    print("KERNEL_OK")
</pallas_src>

<mosaic_0001>
module attributes {stable_mosaic.version = 11 : i64} {
  func.func @_fused_forward_kernel(%arg0: i32, %arg1: memref<16x128xf32, #tpu.memory_space<vmem>>, %arg2: memref<16x128xf32, #tpu.memory_space<vmem>>, %arg3: memref<128x16xf32, #tpu.memory_space<vmem>>, %arg4: memref<16x128xf32, #tpu.memory_space<vmem>>, %arg5: memref<128x16xf32, #tpu.memory_space<vmem>>, %arg6: memref<4x128xf32, #tpu.memory_space<vmem>>, %arg7: memref<1x128xf32, #tpu.memory_space<vmem>>, %arg8: memref<2x16x1xf32, #tpu.memory_space<vmem>>, %arg9: memref<1x128x128xf32, #tpu.memory_space<vmem>>, %arg10: memref<1x1x128xf32, #tpu.memory_space<vmem>>, %arg11: memref<1x4x4xf32, #tpu.memory_space<vmem>>, %arg12: memref<1x4x1xf32, #tpu.memory_space<vmem>>, %arg13: memref<1x1x4xf32, #tpu.memory_space<vmem>>, %arg14: memref<1x1x1xf32, #tpu.memory_space<vmem>>, %arg15: memref<128x3xf32, #tpu.memory_space<vmem>>, %arg16: memref<1x3xf32, #tpu.memory_space<vmem>>, %arg17: memref<2x3xf32, #tpu.memory_space<vmem>>, %arg18: memref<16x128xf32, #tpu.memory_space<vmem>>, %arg19: memref<16x128xf32, #tpu.memory_space<vmem>>) attributes {dimension_semantics = [#tpu.dimension_semantics<arbitrary>], iteration_bounds = array<i64: 7>, scalar_prefetch = 0 : i64, scratch_operands = 2 : i64, tpu.core_type = #tpu.core_type<tc>, window_params = [{pipeline_mode = #tpu.pipeline_mode<synchronous>, transform_indices = @transform_0, window_bounds = array<i64: 16, 128>}, {pipeline_mode = #tpu.pipeline_mode<synchronous>, transform_indices = @transform_1, window_bounds = array<i64: 16, 128>}, {pipeline_mode = #tpu.pipeline_mode<synchronous>, transform_indices = @transform_2, window_bounds = array<i64: 128, 16>}, {pipeline_mode = #tpu.pipeline_mode<synchronous>, transform_indices = @transform_3, window_bounds = array<i64: 16, 128>}, {pipeline_mode = #tpu.pipeline_mode<synchronous>, transform_indices = @transform_4, window_bounds = array<i64: 128, 16>}, {pipeline_mode = #tpu.pipeline_mode<synchronous>, transform_indices = @transform_5, window_bounds = array<i64: 4, 128>}, {pipeline_mode = #tpu.pipeline_mode<synchronous>, transform_indices = @transform_6, window_bounds = array<i64: 1, 128>}, {pipeline_mode = #tpu.pipeline_mode<synchronous>, transform_indices = @transform_7, window_bounds = array<i64: 2, 16, 1>}, {transform_indices = @transform_8, window_bounds = array<i64: 1, 128, 128>}, {transform_indices = @transform_9, window_bounds = array<i64: 1, 1, 128>}, {transform_indices = @transform_10, window_bounds = array<i64: 1, 4, 4>}, {transform_indices = @transform_11, window_bounds = array<i64: 1, 4, 1>}, {transform_indices = @transform_12, window_bounds = array<i64: 1, 1, 4>}, {transform_indices = @transform_13, window_bounds = array<i64: 1, 1, 1>}, {pipeline_mode = #tpu.pipeline_mode<synchronous>, transform_indices = @transform_14, window_bounds = array<i64: 128, 3>}, {pipeline_mode = #tpu.pipeline_mode<synchronous>, transform_indices = @transform_15, window_bounds = array<i64: 1, 3>}, {pipeline_mode = #tpu.pipeline_mode<synchronous>, transform_indices = @transform_16, window_bounds = array<i64: 2, 3>}]} {
    %c0_i32 = arith.constant 0 : i32
    %0 = arith.cmpi eq, %arg0, %c0_i32 : i32
    %1 = arith.extui %0 : i1 to i32
    %c0_i32_0 = arith.constant 0 : i32
    %2 = arith.cmpi ne, %1, %c0_i32_0 : i32
    scf.if %2 {
      %c0_66 = arith.constant 0 : index
      %c0_67 = arith.constant 0 : index
      %103 = vector.load %arg1[%c0_66, %c0_67] : memref<16x128xf32, #tpu.memory_space<vmem>>, vector<16x128xf32>
      %c0_68 = arith.constant 0 : index
      %c0_69 = arith.constant 0 : index
      %104 = vector.load %arg18[%c0_68, %c0_69] : memref<16x128xf32, #tpu.memory_space<vmem>>, vector<16x128xf32>
      tpu.vector_store %arg18[%c0_68, %c0_69], %103 {strides = array<i32>} : memref<16x128xf32, #tpu.memory_space<vmem>>, vector<16x128xf32>,
      %cst_70 = arith.constant 0.000000e+00 : f32
      %105 = vector.broadcast %cst_70 : f32 to vector<16x128xf32>
      %c0_71 = arith.constant 0 : index
      %c0_72 = arith.constant 0 : index
      %106 = vector.load %arg19[%c0_71, %c0_72] : memref<16x128xf32, #tpu.memory_space<vmem>>, vector<16x128xf32>
      tpu.vector_store %arg19[%c0_71, %c0_72], %105 {strides = array<i32>} : memref<16x128xf32, #tpu.memory_space<vmem>>, vector<16x128xf32>,
    } else {
    }
    %c0 = arith.constant 0 : index
    %c0_1 = arith.constant 0 : index
    %3 = vector.load %arg18[%c0, %c0_1] : memref<16x128xf32, #tpu.memory_space<vmem>>, vector<16x128xf32>
    %cst = arith.constant dense<0.000000e+00> : vector<128xf32>
    %4 = vector.multi_reduction <add>, %3, %cst [0] : vector<16x128xf32> to vector<128xf32>
    %5 = vector.shape_cast %4 : vector<128xf32> to vector<1x128xf32>
    %cst_2 = arith.constant 1.600000e+01 : f32
    %6 = vector.broadcast %cst_2 : f32 to vector<1x128xf32>
    %7 = arith.divf %5, %6 : vector<1x128xf32>
    %8 = vector.broadcast %7 : vector<1x128xf32> to vector<16x128xf32>
    %9 = arith.subf %3, %8 : vector<16x128xf32>
    %10 = arith.mulf %9, %9 : vector<16x128xf32>
    %cst_3 = arith.constant dense<0.000000e+00> : vector<128xf32>
    %11 = vector.multi_reduction <add>, %10, %cst_3 [0] : vector<16x128xf32> to vector<128xf32>
    %12 = vector.shape_cast %11 : vector<128xf32> to vector<1x128xf32>
    %cst_4 = arith.constant 1.600000e+01 : f32
    %13 = vector.broadcast %cst_4 : f32 to vector<1x128xf32>
    %14 = arith.divf %12, %13 : vector<1x128xf32>
    %15 = vector.broadcast %7 : vector<1x128xf32> to vector<16x128xf32>
    %16 = arith.subf %3, %15 : vector<16x128xf32>
    %cst_5 = arith.constant 9.99999974E-6 : f32
    %17 = vector.broadcast %cst_5 : f32 to vector<1x128xf32>
    %18 = arith.addf %14, %17 : vector<1x128xf32>
    %19 = math.rsqrt %18 : vector<1x128xf32>
    %20 = vector.broadcast %19 : vector<1x128xf32> to vector<16x128xf32>
    %21 = arith.mulf %16, %20 : vector<16x128xf32>
    %cst_6 = arith.constant 0.000000e+00 : f32
    %22 = vector.broadcast %cst_6 : f32 to vector<16x128xf32>
    %23 = arith.maximumf %21, %22 : vector<16x128xf32>
    %c0_i32_7 = arith.constant 0 : i32
    %24 = arith.cmpi eq, %arg0, %c0_i32_7 : i32
    %25 = arith.select %24, %3, %23 : vector<16x128xf32>
    %c0_8 = arith.constant 0 : index
    %c0_9 = arith.constant 0 : index
    %c0_10 = arith.constant 0 : index
    %26 = vector.load %arg11[%c0_8, %c0_9, %c0_10] : memref<1x4x4xf32, #tpu.memory_space<vmem>>, vector<1x4x4xf32>
    %27 = vector.shape_cast %26 : vector<1x4x4xf32> to vector<4x4xf32>
    %c0_11 = arith.constant 0 : index
    %c0_12 = arith.constant 0 : index
    %28 = vector.load %arg6[%c0_11, %c0_12] : memref<4x128xf32, #tpu.memory_space<vmem>>, vector<4x128xf32>
    %cst_13 = arith.constant dense<0.000000e+00> : vector<4x128xf32>
    %29 = tpu.matmul %27, %28, %cst_13 {dimension_numbers = #tpu.dot_dimension_numbers<[1], [0], [0], [1], [0, 0, 1, 1], [], []>} : vector<4x4xf32>, vector<4x128xf32>, vector<4x128xf32> -> vector<4x128xf32>
    %c0_14 = arith.constant 0 : index
    %c0_15 = arith.constant 0 : index
    %c0_16 = arith.constant 0 : index
    %30 = vector.load %arg12[%c0_14, %c0_15, %c0_16] : memref<1x4x1xf32, #tpu.memory_space<vmem>>, vector<1x4x1xf32>
    %31 = vector.shape_cast %30 : vector<1x4x1xf32> to vector<4x1xf32>
    %32 = vector.broadcast %31 : vector<4x1xf32> to vector<4x128xf32>
    %33 = arith.addf %29, %32 : vector<4x128xf32>
    %cst_17 = arith.constant 0.000000e+00 : f32
    %34 = vector.broadcast %cst_17 : f32 to vector<4x128xf32>
    %35 = arith.maximumf %33, %34 : vector<4x128xf32>
    %c0_18 = arith.constant 0 : index
    %c0_19 = arith.constant 0 : index
    %c0_20 = arith.constant 0 : index
    %36 = vector.load %arg13[%c0_18, %c0_19, %c0_20] : memref<1x1x4xf32, #tpu.memory_space<vmem>>, vector<1x1x4xf32>
    %37 = vector.shape_cast %36 : vector<1x1x4xf32> to vector<1x4xf32>
    %cst_21 = arith.constant dense<0.000000e+00> : vector<1x128xf32>
    %38 = tpu.matmul %37, %35, %cst_21 {dimension_numbers = #tpu.dot_dimension_numbers<[1], [0], [0], [1], [0, 0, 1, 1], [], []>} : vector<1x4xf32>, vector<4x128xf32>, vector<1x128xf32> -> vector<1x128xf32>
    %c0_22 = arith.constant 0 : index
    %c0_23 = arith.constant 0 : index
    %c0_24 = arith.constant 0 : index
    %39 = vector.load %arg14[%c0_22, %c0_23, %c0_24] : memref<1x1x1xf32, #tpu.memory_space<vmem>>, vector<1x1x1xf32>
    %40 = vector.shape_cast %39 : vector<1x1x1xf32> to vector<1x1xf32>
    %41 = vector.broadcast %40 : vector<1x1xf32> to vector<1x128xf32>
    %42 = arith.addf %38, %41 : vector<1x128xf32>
    %c0_25 = arith.constant 0 : index
    %c0_26 = arith.constant 0 : index
    %43 = vector.load %arg7[%c0_25, %c0_26] : memref<1x128xf32, #tpu.memory_space<vmem>>, vector<1x128xf32>
    %cst_27 = arith.constant 1.000000e+00 : f32
    %44 = vector.broadcast %cst_27 : f32 to vector<1x128xf32>
    %45 = arith.subf %44, %43 : vector<1x128xf32>
    %46 = arith.negf %42 : vector<1x128xf32>
    %47 = math.exp %46 : vector<1x128xf32>
    %cst_28 = arith.constant 1.000000e+00 : f32
    %48 = vector.broadcast %cst_28 : f32 to vector<1x128xf32>
    %49 = arith.addf %48, %47 : vector<1x128xf32>
    %50 = arith.divf %48, %49 : vector<1x128xf32>
    %51 = arith.mulf %45, %50 : vector<1x128xf32>
    %52 = arith.addf %43, %51 : vector<1x128xf32>
    %c0_29 = arith.constant 0 : index
    %c0_30 = arith.constant 0 : index
    %53 = vector.load %arg2[%c0_29, %c0_30] : memref<16x128xf32, #tpu.memory_space<vmem>>, vector<16x128xf32>
    %c0_31 = arith.constant 0 : index
    %c0_32 = arith.constant 0 : index
    %54 = vector.load %arg3[%c0_31, %c0_32] : memref<128x16xf32, #tpu.memory_space<vmem>>, vector<128x16xf32>
    %cst_33 = arith.constant dense<0.000000e+00> : vector<1x16xf32>
    %55 = tpu.matmul %52, %54, %cst_33 {dimension_numbers = #tpu.dot_dimension_numbers<[1], [0], [0], [1], [0, 0, 1, 1], [], []>} : vector<1x128xf32>, vector<128x16xf32>, vector<1x16xf32> -> vector<1x16xf32>
    %cst_34 = arith.constant 0.000000e+00 : f32
    %56 = vector.broadcast %cst_34 : f32 to vector<1x16xf32>
    %57 = arith.cmpf ogt, %55, %56 : vector<1x16xf32>
    %58 = math.rsqrt %55 : vector<1x16xf32>
    %cst_35 = arith.constant 0.000000e+00 : f32
    %59 = vector.broadcast %cst_35 : f32 to vector<1x16xf32>
    %60 = arith.select %57, %58, %59 : vector<1x16xi1>, vector<1x16xf32>
    %c0_36 = arith.constant 0 : index
    %c0_37 = arith.constant 0 : index
    %61 = vector.load %arg4[%c0_36, %c0_37] : memref<16x128xf32, #tpu.memory_space<vmem>>, vector<16x128xf32>
    %cst_38 = arith.constant dense<0.000000e+00> : vector<1x128xf32>
    %62 = tpu.matmul %60, %61, %cst_38 {dimension_numbers = #tpu.dot_dimension_numbers<[1], [0], [0], [1], [0, 0, 1, 1], [], []>} : vector<1x16xf32>, vector<16x128xf32>, vector<1x128xf32> -> vector<1x128xf32>
    %cst_39 = arith.constant dense<0.000000e+00> : vector<1x128xf32>
    %63 = tpu.matmul %60, %53, %cst_39 {dimension_numbers = #tpu.dot_dimension_numbers<[1], [0], [0], [1], [0, 0, 1, 1], [], []>} : vector<1x16xf32>, vector<16x128xf32>, vector<1x128xf32> -> vector<1x128xf32>
    %64 = arith.mulf %62, %52 : vector<1x128xf32>
    %65 = arith.mulf %64, %63 : vector<1x128xf32>
    %66 = vector.broadcast %65 : vector<1x128xf32> to vector<16x128xf32>
    %67 = arith.mulf %53, %66 : vector<16x128xf32>
    %c0_40 = arith.constant 0 : index
    %c0_41 = arith.constant 0 : index
    %68 = vector.load %arg5[%c0_40, %c0_41] : memref<128x16xf32, #tpu.memory_space<vmem>>, vector<128x16xf32>
    %cst_42 = arith.constant dense<0.000000e+00> : vector<16x16xf32>
    %69 = tpu.matmul %67, %68, %cst_42 {dimension_numbers = #tpu.dot_dimension_numbers<[1], [0], [0], [1], [0, 0, 1, 1], [], []>} : vector<16x128xf32>, vector<128x16xf32>, vector<16x16xf32> -> vector<16x16xf32>
    %c0_43 = arith.constant 0 : index
    %c0_44 = arith.constant 0 : index
    %c0_45 = arith.constant 0 : index
    %70 = vector.load %arg9[%c0_43, %c0_44, %c0_45] : memref<1x128x128xf32, #tpu.memory_space<vmem>>, vector<1x128x128xf32>
    %71 = vector.shape_cast %70 : vector<1x128x128xf32> to vector<128x128xf32>
    %cst_46 = arith.constant dense<0.000000e+00> : vector<16x128xf32>
    %72 = tpu.matmul %25, %71, %cst_46 {dimension_numbers = #tpu.dot_dimension_numbers<[1], [0], [0], [1], [0, 0, 1, 1], [], []>} : vector<16x128xf32>, vector<128x128xf32>, vector<16x128xf32> -> vector<16x128xf32>
    %cst_47 = arith.constant dense<0.000000e+00> : vector<16x128xf32>
    %73 = tpu.matmul %69, %72, %cst_47 {dimension_numbers = #tpu.dot_dimension_numbers<[1], [0], [0], [1], [0, 0, 1, 1], [], []>} : vector<16x16xf32>, vector<16x128xf32>, vector<16x128xf32> -> vector<16x128xf32>
    %c0_48 = arith.constant 0 : index
    %c0_49 = arith.constant 0 : index
    %c0_50 = arith.constant 0 : index
    %74 = vector.load %arg10[%c0_48, %c0_49, %c0_50] : memref<1x1x128xf32, #tpu.memory_space<vmem>>, vector<1x1x128xf32>
    %75 = vector.shape_cast %74 : vector<1x1x128xf32> to vector<1x128xf32>
    %76 = vector.broadcast %75 : vector<1x128xf32> to vector<16x128xf32>
    %77 = arith.addf %73, %76 : vector<16x128xf32>
    %c0_51 = arith.constant 0 : index
    %c0_52 = arith.constant 0 : index
    %78 = vector.load %arg19[%c0_51, %c0_52] : memref<16x128xf32, #tpu.memory_space<vmem>>, vector<16x128xf32>
    %c0_i32_53 = arith.constant 0 : i32
    %79 = arith.cmpi sgt, %arg0, %c0_i32_53 : i32
    %c1_i32 = arith.constant 1 : i32
    %c0_i32_54 = arith.constant 0 : i32
    %80 = arith.cmpi eq, %c1_i32, %c0_i32_54 : i32
    %c1_i32_55 = arith.constant 1 : i32
    %81 = arith.select %80, %c1_i32_55, %c1_i32 : i32
    %82 = arith.remsi %arg0, %81 : i32
    %c0_i32_56 = arith.constant 0 : i32
    %83 = arith.cmpi ne, %82, %c0_i32_56 : i32
    %c0_i32_57 = arith.constant 0 : i32
    %84 = arith.cmpi slt, %82, %c0_i32_57 : i32
    %c0_i32_58 = arith.constant 0 : i32
    %85 = arith.cmpi slt, %81, %c0_i32_58 : i32
    %86 = arith.xori %84, %85 : i1
    %87 = arith.andi %86, %83 : i1
    %88 = arith.addi %82, %81 : i32
    %89 = arith.select %87, %88, %82 : i32
    %c0_i32_59 = arith.constant 0 : i32
    %90 = arith.cmpi eq, %89, %c0_i32_59 : i32
    %91 = arith.andi %79, %90 : i1
    %92 = arith.addf %77, %78 : vector<16x128xf32>
    %93 = arith.select %91, %92, %77 : vector<16x128xf32>
    %c0_i32_60 = arith.constant 0 : i32
    %94 = arith.cmpi eq, %arg0, %c0_i32_60 : i32
    %95 = arith.addf %78, %93 : vector<16x128xf32>
    %96 = arith.select %91, %95, %78 : vector<16x128xf32>
    %97 = arith.select %94, %77, %96 : vector<16x128xf32>
    %c0_61 = arith.constant 0 : index
    %c0_62 = arith.constant 0 : index
    %98 = vector.load %arg18[%c0_61, %c0_62] : memref<16x128xf32, #tpu.memory_space<vmem>>, vector<16x128xf32>
    tpu.vector_store %arg18[%c0_61, %c0_62], %93 {strides = array<i32>} : memref<16x128xf32, #tpu.memory_space<vmem>>, vector<16x128xf32>,
    %c0_63 = arith.constant 0 : index
    %c0_64 = arith.constant 0 : index
    %99 = vector.load %arg19[%c0_63, %c0_64] : memref<16x128xf32, #tpu.memory_space<vmem>>, vector<16x128xf32>
    tpu.vector_store %arg19[%c0_63, %c0_64], %97 {strides = array<i32>} : memref<16x128xf32, #tpu.memory_space<vmem>>, vector<16x128xf32>,
    %c6_i32 = arith.constant 6 : i32
    %100 = arith.cmpi eq, %arg0, %c6_i32 : i32
    %101 = arith.extui %100 : i1 to i32
    %c0_i32_65 = arith.constant 0 : i32
    %102 = arith.cmpi ne, %101, %c0_i32_65 : i32
    scf.if %102 {
      %cst_66 = arith.constant 0.000000e+00 : f32
      %103 = vector.broadcast %cst_66 : f32 to vector<16x128xf32>
      %104 = arith.maximumf %93, %103 : vector<16x128xf32>
      %c0_67 = arith.constant 0 : index
      %c0_68 = arith.constant 0 : index
      %c0_69 = arith.constant 0 : index
      %105 = vector.load %arg8[%c0_67, %c0_68, %c0_69] : memref<2x16x1xf32, #tpu.memory_space<vmem>>, vector<2x16x1xf32>
      %106 = vector.shape_cast %104 : vector<16x128xf32> to vector<1x16x128xf32>
      %107 = vector.broadcast %105 : vector<2x16x1xf32> to vector<2x16x128xf32>
      %108 = vector.broadcast %106 : vector<1x16x128xf32> to vector<2x16x128xf32>
      %109 = arith.mulf %107, %108 : vector<2x16x128xf32>
      %cst_70 = arith.constant dense<0xFF800000> : vector<2x128xf32>
      %110 = vector.multi_reduction <maximumf>, %109, %cst_70 [1] : vector<2x16x128xf32> to vector<2x128xf32>
      %c0_71 = arith.constant 0 : index
      %c0_72 = arith.constant 0 : index
      %111 = vector.load %arg15[%c0_71, %c0_72] : memref<128x3xf32, #tpu.memory_space<vmem>>, vector<128x3xf32>
      %cst_73 = arith.constant dense<0.000000e+00> : vector<2x3xf32>
      %112 = tpu.matmul %110, %111, %cst_73 {dimension_numbers = #tpu.dot_dimension_numbers<[1], [0], [0], [1], [0, 0, 1, 1], [], []>} : vector<2x128xf32>, vector<128x3xf32>, vector<2x3xf32> -> vector<2x3xf32>
      %c0_74 = arith.constant 0 : index
      %c0_75 = arith.constant 0 : index
      %113 = vector.load %arg16[%c0_74, %c0_75] : memref<1x3xf32, #tpu.memory_space<vmem>>, vector<1x3xf32>
      %114 = vector.broadcast %113 : vector<1x3xf32> to vector<2x3xf32>
      %115 = arith.addf %112, %114 : vector<2x3xf32>
      %c0_76 = arith.constant 0 : index
      %c0_77 = arith.constant 0 : index
      %116 = vector.load %arg17[%c0_76, %c0_77] : memref<2x3xf32, #tpu.memory_space<vmem>>, vector<2x3xf32>
      tpu.vector_store %arg17[%c0_76, %c0_77], %115 {strides = array<i32>} : memref<2x3xf32, #tpu.memory_space<vmem>>, vector<2x3xf32>,
    } else {
    }
    return
  }
  func.func @transform_0(%arg0: i32) -> (i32, i32) {
    %c0_i32 = arith.constant 0 : i32
    %c0_i32_0 = arith.constant 0 : i32
    %c0_i32_1 = arith.constant 0 : i32
    return %c0_i32, %c0_i32_0 : i32, i32
  }
  func.func @transform_1(%arg0: i32) -> (i32, i32) {
    %c0_i32 = arith.constant 0 : i32
    %c0_i32_0 = arith.constant 0 : i32
    %c0_i32_1 = arith.constant 0 : i32
    return %c0_i32, %c0_i32_0 : i32, i32
  }
  func.func @transform_2(%arg0: i32) -> (i32, i32) {
    %c0_i32 = arith.constant 0 : i32
    %c0_i32_0 = arith.constant 0 : i32
    %c0_i32_1 = arith.constant 0 : i32
    return %c0_i32, %c0_i32_0 : i32, i32
  }
  func.func @transform_3(%arg0: i32) -> (i32, i32) {
    %c0_i32 = arith.constant 0 : i32
    %c0_i32_0 = arith.constant 0 : i32
    %c0_i32_1 = arith.constant 0 : i32
    return %c0_i32, %c0_i32_0 : i32, i32
  }
  func.func @transform_4(%arg0: i32) -> (i32, i32) {
    %c0_i32 = arith.constant 0 : i32
    %c0_i32_0 = arith.constant 0 : i32
    %c0_i32_1 = arith.constant 0 : i32
    return %c0_i32, %c0_i32_0 : i32, i32
  }
  func.func @transform_5(%arg0: i32) -> (i32, i32) {
    %c0_i32 = arith.constant 0 : i32
    %c0_i32_0 = arith.constant 0 : i32
    %c0_i32_1 = arith.constant 0 : i32
    return %c0_i32, %c0_i32_0 : i32, i32
  }
  func.func @transform_6(%arg0: i32) -> (i32, i32) {
    %c0_i32 = arith.constant 0 : i32
    %c0_i32_0 = arith.constant 0 : i32
    %c0_i32_1 = arith.constant 0 : i32
    return %c0_i32, %c0_i32_0 : i32, i32
  }
  func.func @transform_7(%arg0: i32) -> (i32, i32, i32) {
    %c0_i32 = arith.constant 0 : i32
    %c0_i32_0 = arith.constant 0 : i32
    %c0_i32_1 = arith.constant 0 : i32
    %c0_i32_2 = arith.constant 0 : i32
    return %c0_i32, %c0_i32_0, %c0_i32_1 : i32, i32, i32
  }
  func.func @transform_8(%arg0: i32) -> (i32, i32, i32) {
    %c0_i32 = arith.constant 0 : i32
    %c0_i32_0 = arith.constant 0 : i32
    %c0_i32_1 = arith.constant 0 : i32
    return %arg0, %c0_i32, %c0_i32_0 : i32, i32, i32
  }
  func.func @transform_9(%arg0: i32) -> (i32, i32, i32) {
    %c0_i32 = arith.constant 0 : i32
    %c0_i32_0 = arith.constant 0 : i32
    %c0_i32_1 = arith.constant 0 : i32
    return %arg0, %c0_i32, %c0_i32_0 : i32, i32, i32
  }
  func.func @transform_10(%arg0: i32) -> (i32, i32, i32) {
    %c0_i32 = arith.constant 0 : i32
    %c0_i32_0 = arith.constant 0 : i32
    %c0_i32_1 = arith.constant 0 : i32
    return %arg0, %c0_i32, %c0_i32_0 : i32, i32, i32
  }
  func.func @transform_11(%arg0: i32) -> (i32, i32, i32) {
    %c0_i32 = arith.constant 0 : i32
    %c0_i32_0 = arith.constant 0 : i32
    %c0_i32_1 = arith.constant 0 : i32
    return %arg0, %c0_i32, %c0_i32_0 : i32, i32, i32
  }
  func.func @transform_12(%arg0: i32) -> (i32, i32, i32) {
    %c0_i32 = arith.constant 0 : i32
    %c0_i32_0 = arith.constant 0 : i32
    %c0_i32_1 = arith.constant 0 : i32
    return %arg0, %c0_i32, %c0_i32_0 : i32, i32, i32
  }
  func.func @transform_13(%arg0: i32) -> (i32, i32, i32) {
    %c0_i32 = arith.constant 0 : i32
    %c0_i32_0 = arith.constant 0 : i32
    %c0_i32_1 = arith.constant 0 : i32
    return %arg0, %c0_i32, %c0_i32_0 : i32, i32, i32
  }
  func.func @transform_14(%arg0: i32) -> (i32, i32) {
    %c0_i32 = arith.constant 0 : i32
    %c0_i32_0 = arith.constant 0 : i32
    %c0_i32_1 = arith.constant 0 : i32
    return %c0_i32, %c0_i32_0 : i32, i32
  }
  func.func @transform_15(%arg0: i32) -> (i32, i32) {
    %c0_i32 = arith.constant 0 : i32
    %c0_i32_0 = arith.constant 0 : i32
    %c0_i32_1 = arith.constant 0 : i32
    return %c0_i32, %c0_i32_0 : i32, i32
  }
  func.func @transform_16(%arg0: i32) -> (i32, i32) {
    %c0_i32 = arith.constant 0 : i32
    %c0_i32_0 = arith.constant 0 : i32
    %c0_i32_1 = arith.constant 0 : i32
    return %c0_i32, %c0_i32_0 : i32, i32
  }
}

</mosaic_0001>

<bundles_post_ra>
// kernel: model_forward.1
= control target key start
LH: loop header
LB: loop body
LE: loop exit
PB: predicated region body
PF: predicated region fallthrough
CT: control target
= control target key end

     0   :  { %s2407_s0 = inlined_call_operand.vmem [shape: f32[16,128], index: 0, kind: input, shape index: {}]   ;;  %s2408_s1 = inlined_call_operand.vmem [shape: f32[16,128], index: 1, kind: input, shape index: {}]   ;;  %s2409_s2 = inlined_call_operand.vmem [shape: f32[128,16], index: 2, kind: input, shape index: {}]   ;;  %s2410_s3 = inlined_call_operand.vmem [shape: f32[16,128], index: 3, kind: input, shape index: {}]   ;;  %s2411_s4 = inlined_call_operand.vmem [shape: f32[128,16], index: 4, kind: input, shape index: {}]   ;;  %s2412_s5 = inlined_call_operand.vmem [shape: f32[4,128], index: 5, kind: input, shape index: {}]   ;;  %s2413_s6 = inlined_call_operand.vmem [shape: f32[1,128], index: 6, kind: input, shape index: {}]   ;;  %s2414_s7 = inlined_call_operand.vmem [shape: f32[2,16,1], index: 7, kind: input, shape index: {}]   ;;  %s2415_s8 = inlined_call_operand.vmem [shape: f32[7,128,128], index: 8, kind: input, shape index: {}]   ;;  %s2416_s9 = inlined_call_operand.vmem [shape: f32[7,1,128], index: 9, kind: input, shape index: {}]   ;;  %s2417_s10 = inlined_call_operand.vmem [shape: f32[7,4,4], index: 10, kind: input, shape index: {}]   ;;  %s2418_s11 = inlined_call_operand.vmem [shape: f32[7,4,1], index: 11, kind: input, shape index: {}]   ;;  %s2419_s12 = inlined_call_operand.vmem [shape: f32[7,1,4], index: 12, kind: input, shape index: {}]   ;;  %s2420_s13 = inlined_call_operand.vmem [shape: f32[7,1,1], index: 13, kind: input, shape index: {}]   ;;  %s2421_s14 = inlined_call_operand.vmem [shape: f32[128,3], index: 14, kind: input, shape index: {}]   ;;  %s2422_s15 = inlined_call_operand.vmem [shape: f32[1,3], index: 15, kind: input, shape index: {}]   ;;  %s2423_s16 = inlined_call_operand.hbm [shape: f32[2,3], index: 16, kind: output, shape index: {}]  }
   0x1   :  { %2428 = sst [smem:[#allocation8_spill]] %s2407_s0 }
   0x2   :  { %2429 = sst [smem:[#allocation9_spill]] %s2414_s7 }
   0x3   :  { %2430 = sst [smem:[#allocation10_spill]] %s2421_s14 }
   0x4   :  { %2431 = sst [smem:[#allocation11_spill]] %s2422_s15 }
   0x5   :  { %2432 = sst [smem:[#allocation12_spill]] %s2423_s16 }
   0x6   :  { %21 = vsyncpa [#allocation5], 0  ;;  %s2035_s21 = smov 0  }
   0x7 LB: > { %2433 = sst [smem:[#allocation7_spill]] %s1940_s21  ;;  %s2041_s22 = sadd.s32 4294967295, %s1940_s21   ;;  %s1940_s21 = sphi %s2035_s21, %s27_s21  }
   0x8   : > { %p1595_p0 = scmp.ge.s32.totalorder %s1940_s21, 1  ;;  %p500_p1 = scmp.lt.s32.totalorder %s1940_s21, 8 }
   0xa   : > { %p501_p2 = pnand %p1595_p0, %p500_p1 }
   0xb   : > { %p562_p3 = scmp.lt.s32.totalorder (!%p501_p2), %s2041_s22, 6  ;;  %p584_p4 = scmp.eq.s32.totalorder (!%p501_p2), %s2041_s22, 0 }
   0xc   : > { %504 = sbr.rel (%p501_p2) target bundleno = 1635 (0x663), region = 84  ;;  %p1600_p5 = scmp.ne.s32.totalorder (!%p501_p2), %s2041_s22, 0 }
  0x11   : > { %s2048_s23 = scalar_select %p562_p3, %s2041_s22, 6 }
  0x12   : > { %587 = sbr.rel (%p1600_p5) target bundleno = 26 (0x1a), region = 88  ;;  %s2434_s29 = sld [smem:[#allocation8_spill]] (!%p1600_p5) }
  0x13   : > { %s1617_s24 = sshll.u32 %s2048_s23, 7  ;;  %s1598_s0 = sshll.u32 %s2048_s23, 2 }
  0x14   : > { %s2058_s30 = scalar_lea.vmem %s2415_s8, %s1617_s24  ;;  %s573_s19 = scalar_lea.vmem %s2417_s10, %s1598_s0 }
  0x15   : > { %s577_s16 = scalar_lea.vmem %s2418_s11, %s1598_s0  ;;  %s580_s7 = scalar_lea.vmem %s2419_s12, %s2048_s23 }
  0x16   : > { %s583_s27 = scalar_lea.vmem %s2420_s13, %s2048_s23 }
  0x17   : > { %v1942_v2 = vmov 0.0  }
  0x18   : > { %v588_v0 = vld [vmem:[%s2434_s29] sm:$0xff]  ;;  %v589_v1 = vld [vmem:[%s2434_s29 + $0x8] sm:$0xff]  ;;  %592 = vst [vmem:[#allocation3 + $0x8] sm:$0xff] %v1942_v2  ;;  %593 = vst [vmem:[#allocation3] sm:$0xff] %v1942_v2 }
  0x19   : > { %590 = vst [vmem:[#allocation2] sm:$0xff] %v588_v0  ;;  %591 = vst [vmem:[#allocation2 + $0x8] sm:$0xff] %v589_v1 }
  0x1a PF: > { %v629_v3 = vld [vmem:[%s2412_s5] sm:$0xf]  ;;  %vm640_vm0 = vcmask 1043456   ;;  %vm636_vm1 = vcmask 31744   ;;  %v1943_v4 = vmov 0.0   ;;  %vm1944_vm2 = vmmov 0  }
  0x1b   : > { %1702 = vmatprep.subr.mxu1 %v1943_v4  ;;  %1704 = vmatprep.mubr.msk.f32.mxu1 %vm1944_vm2, %v1943_v4  ;;  %v628_v5 = vld [vmem:[%s573_s19] sm:$0xf]  ;;  %v1945_v7 = vmov 0   ;;  %v829_v15 = vld [vmem:[%s2409_s2 + $0x78] sm:$0xff]  ;;  %v828_v16 = vld [vmem:[%s2409_s2 + $0x70] sm:$0xff]  ;;  %v722_v31 = vlaneseq  ;;  %vm905_vm3 = vcmask 130048   ;;  %s2437_s19 = scalar_lea.vmem %s2416_s9, %s2048_s23 }
  0x1c   : > { %v630_v6 = vld [vmem:[%s577_s16] sm:$0xf]  ;;  %1703 = vmatpush3.msk.msra.mxu1 %vm640_vm0, %v629_v3  ;;  %1895 = vset.pattern.permute.xlu0 %v1945_v7  ;;  %v827_v17 = vld [vmem:[%s2409_s2 + $0x68] sm:$0xff]  ;;  %v825_v19 = vld [vmem:[%s2409_s2 + $0x58] sm:$0xff]  ;;  %s623_s26 = scalar_select %p584_p4, 1, 0 }
  0x1d   : > { %1705 = vmatmul.mubr.msk.f32.vlgmr.msra.gmra.mxu1 %vm636_vm1, %v628_v5  ;;  %633 = vperm.xlu0 %1895, %v630_v6   ;;  %v716_v8 = vld [vmem:[%s583_s27] sm:$0x1]  ;;  %v824_v20 = vld [vmem:[%s2409_s2 + $0x50] sm:$0xff]  ;;  %v823_v21 = vld [vmem:[%s2409_s2 + $0x48] sm:$0xff]  ;;  %v2169_v32 = vshrl.u32 %v722_v31, 7  ;;  %p1329_p6 = scmp.gt.s32.totalorder %s2041_s22, 0 }
  0x1e   : > { %1707 = vmatprep.subr.mxu1 %v1943_v4  ;;  %1709 = vmatprep.mubr.msk.f32.mxu1 %vm1944_vm2, %v1943_v4  ;;  %v715_v14 = vld [vmem:[%s580_s7] sm:$0x1]  ;;  %v821_v23 = vld [vmem:[%s2409_s2 + $0x38] sm:$0xff]  ;;  %v820_v24 = vld [vmem:[%s2409_s2 + $0x30] sm:$0xff]  ;;  %p1611_p7 = scmp.ne.s32.totalorder %s2041_s22, 6 }
  0x1f   : > { %1712 = vmatprep.subr.mxu0 %v1943_v4  ;;  %1744 = vmatprep.mubr.msk.f32.mxu0 %vm1944_vm2, %v1943_v4  ;;  %v826_v18 = vld [vmem:[%s2409_s2 + $0x60] sm:$0xff]  ;;  %v819_v25 = vld [vmem:[%s2409_s2 + $0x28] sm:$0xff]  ;;  %v817_v27 = vld [vmem:[%s2409_s2 + $0x18] sm:$0xff]  ;;  %v724_v33 = vsub.s32 0, %v2169_v32  ;;  %s1332_s21 = scalar_select %p1329_p6, 1, 0 }
  0x20   : > { %1713 = vmatpush3.msra.mxu0 %v829_v15  ;;  %v822_v22 = vld [vmem:[%s2409_s2 + $0x40] sm:$0xff]  ;;  %v816_v28 = vld [vmem:[%s2409_s2 + $0x10] sm:$0xff]  ;;  %v815_v29 = vld [vmem:[%s2409_s2 + $0x8] sm:$0xff]  ;;  %s2440_s7 = sld [smem:[#allocation9_spill]] (!%p1611_p7) }
  0x21   : > { %719 = vperm.xlu0 %1895, %v716_v8   ;;  %1714 = vmatprep.subr.mxu0 %v1943_v4  ;;  %v818_v26 = vld [vmem:[%s2409_s2 + $0x20] sm:$0xff]  ;;  %v904_v47 = vld [vmem:[%s2410_s3 + $0x8] sm:$0xff]  ;;  %v1163_v49 = vld [vmem:[%s2058_s30 + $0x78] sm:$0xff]  ;;  %s2441_s17 = sld [smem:[#allocation10_spill]] (!%p1611_p7) }
  0x22   : > { %1715 = vmatpush3.msra.mxu0 %v828_v16  ;;  %v814_v30 = vld [vmem:[%s2409_s2] sm:$0xff]  ;;  %v1162_v50 = vld [vmem:[%s2058_s30 + $0x70] sm:$0xff]  ;;  %v1161_v51 = vld [vmem:[%s2058_s30 + $0x68] sm:$0xff]  ;;  %s2442_s27 = sld [smem:[#allocation11_spill]] (!%p1611_p7) }
  0x23   : > { %1716 = vmatprep.subr.mxu0 %v1943_v4  ;;  %v802_v42 = vld [vmem:[%s2413_s6] sm:$0x1]  ;;  %v1159_v53 = vld [vmem:[%s2058_s30 + $0x58] sm:$0xff]  ;;  %v1158_v54 = vld [vmem:[%s2058_s30 + $0x50] sm:$0xff] }
  0x24   : > { %1717 = vmatpush3.msra.mxu0 %v827_v17  ;;  %v803_v43 = vsub.f32 1.0, %v802_v42  ;;  %v903_v48 = vld [vmem:[%s2410_s3] sm:$0xff]  ;;  %v1157_v55 = vld [vmem:[%s2058_s30 + $0x48] sm:$0xff]  ;;  %v1155_v57 = vld [vmem:[%s2058_s30 + $0x38] sm:$0xff] }
  0x25   : > { %1718 = vmatprep.subr.mxu0 %v1943_v4  ;;  %v1160_v52 = vld [vmem:[%s2058_s30 + $0x60] sm:$0xff]  ;;  %v1154_v58 = vld [vmem:[%s2058_s30 + $0x30] sm:$0xff]  ;;  %v1153_v59 = vld [vmem:[%s2058_s30 + $0x28] sm:$0xff] }
  0x26   : > { %1719 = vmatpush3.msra.mxu0 %v826_v18  ;;  %v1156_v56 = vld [vmem:[%s2058_s30 + $0x40] sm:$0xff]  ;;  %v2202_v63 = vld [vmem:[%s2408_s1 + $0x8] sm:$0xff]  ;;  %v1072_v2 = vld [vmem:[%s2411_s4 + $0x78] sm:$0xff] }
  0x27   : > { %1720 = vmatprep.subr.mxu0 %v1943_v4  ;;  %v2208_v1 = vld [vmem:[%s2408_s1] sm:$0xff]  ;;  %v1071_v3 = vld [vmem:[%s2411_s4 + $0x70] sm:$0xff]  ;;  %v1070_v5 = vld [vmem:[%s2411_s4 + $0x68] sm:$0xff] }
  0x28   : > { %1721 = vmatpush3.msra.mxu0 %v825_v19  ;;  %v1068_v6 = vld [vmem:[%s2411_s4 + $0x58] sm:$0xff]  ;;  %v1067_v7 = vld [vmem:[%s2411_s4 + $0x50] sm:$0xff]  ;;  %v1066_v8 = vld [vmem:[%s2411_s4 + $0x48] sm:$0xff] }
  0x29   : > { %1722 = vmatprep.subr.mxu0 %v1943_v4  ;;  %v1063_v16 = vld [vmem:[%s2411_s4 + $0x30] sm:$0xff]  ;;  %v1608_v32 = vld [vmem:[%s2437_s19] ss:$0 sm:$0xff] }
  0x2a   : > { %1723 = vmatpush3.msra.mxu0 %v824_v20 }
  0x2b   : > { %1724 = vmatprep.subr.mxu0 %v1943_v4 }
  0x2c   : > { %1725 = vmatpush3.msra.mxu0 %v823_v21 }
  0x2d   : > { %1726 = vmatprep.subr.mxu0 %v1943_v4 }
  0x2e   : > { %1727 = vmatpush3.msra.mxu0 %v822_v22 }
  0x2f   : > { %1728 = vmatprep.subr.mxu0 %v1943_v4 }
  0x30   : > { %1729 = vmatpush3.msra.mxu0 %v821_v23 }
  0x31   : > { %1730 = vmatprep.subr.mxu0 %v1943_v4 }
  0x32   : > { %1731 = vmatpush3.msra.mxu0 %v820_v24 }
  0x33   : > { %1732 = vmatprep.subr.mxu0 %v1943_v4 }
  0x34   : > { %1733 = vmatpush3.msra.mxu0 %v819_v25 }
  0x35   : > { %1734 = vmatprep.subr.mxu0 %v1943_v4 }
  0x36   : > { %1735 = vmatpush3.msra.mxu0 %v818_v26 }
  0x37   : > { %1736 = vmatprep.subr.mxu0 %v1943_v4 }
  0x38   : > { %1737 = vmatpush3.msra.mxu0 %v817_v27 }
  0x39   : > { %1738 = vmatprep.subr.mxu0 %v1943_v4 }
  0x3a   : > { %1739 = vmatpush3.msra.mxu0 %v816_v28 }
  0x3b   : > { %1740 = vmatprep.subr.mxu0 %v1943_v4 }
  0x3c   : > { %1741 = vmatpush3.msra.mxu0 %v815_v29 }
  0x3d   : > { %1742 = vmatprep.subr.mxu0 %v1943_v4 }
  0x3e   : > { %1743 = vmatpush3.msra.mxu0 %v814_v30 }
  0x3f   : > { %1796 = vmatprep.subr.mxu0 %v1163_v49 }
  0x98   : > { %v634_v9 = vpop.permute.xlu0 %633 }
  0x9c   : > { %v720_v34 = vpop.permute.xlu0 %719 }
  0x9d   : > { %v725_v35 = vrot.slane %v720_v34, %v724_v33 }
  0xdd   : > { %v710_v10 = vpop.f32.mrf.mxu1 }
  0xde   : > { %v711_v11 = vadd.f32 %v710_v10, %v634_v9  ;;  %v2237_v9 = vld [vmem:[#allocation2] sm:$0xff]  ;;  %v2239_v10 = vld [vmem:[#allocation2 + $0x8] sm:$0xff] }
  0xdf   : > { %v1706_v12 = vpop.f32.mrf.mxu1 }
  0xe0   : > { %v714_v13 = vmax.f32 %v711_v11, 0.0  ;;  %v596_v11 = vadd.f32 %v2239_v10, %v2237_v9  ;;  %v1065_v12 = vld [vmem:[%s2411_s4 + $0x40] sm:$0xff] }
  0xe2   : > { %1708 = vmatpush3.msk.msra.mxu1 %vm640_vm0, %v714_v13  ;;  %v597_v13 = vrot.slane %v596_v11, 4 }
  0xe3   : > { %1710 = vmatmul.mubr.msk.f32.vlgmr.msra.gmra.mxu1 %vm636_vm1, %v715_v14  ;;  %1747 = vmatprep.subr.mxu1 %v1943_v4  ;;  %v1064_v14 = vld [vmem:[%s2411_s4 + $0x38] sm:$0xff] }
  0xe4   : > { %1751 = vmatprep.mubr.msk.f32.mxu1 %vm1944_vm2, %v1943_v4  ;;  %1748 = vmatpush3.msra.mxu1 %v904_v47  ;;  %v598_v15 = vadd.f32 %v597_v13, %v596_v11  ;;  %v1327_v11 = vld [vmem:[#allocation3 + $0x8] sm:$0xff] }
  0xe5   : > { %1749 = vmatprep.subr.mxu1 %v1943_v4 }
  0xe6   : > { %1750 = vmatpush3.msra.mxu1 %v903_v48  ;;  %v599_v17 = vrot.slane %v598_v15, 2 }
  0xe7   : > { %1754 = vmatprep.subr.mxu1 %v1943_v4 }
  0xe8   : > { %v600_v18 = vadd.f32 %v599_v17, %v598_v15 }
  0xea   : > { %v601_v19 = vrot.slane %v600_v18, 1 }
  0xec   : > { %v602_v20 = vadd.f32 %v601_v19, %v600_v18 }
  0xee   : > { %v604_v21 = vmul.f32 0.0625, %v602_v20 }
  0xf0   : > { %v605_v22 = vsub.f32 %v2237_v9, %v604_v21  ;;  %v606_v23 = vsub.f32 %v2239_v10, %v604_v21 }
  0xf2   : > { %v607_v24 = vmul.f32 %v605_v22, %v605_v22  ;;  %v608_v25 = vmul.f32 %v606_v23, %v606_v23 }
  0xf4   : > { %v609_v26 = vadd.f32 %v608_v25, %v607_v24 }
  0xf6   : > { %v610_v27 = vrot.slane %v609_v26, 4 }
  0xf8   : > { %v611_v28 = vadd.f32 %v610_v27, %v609_v26 }
  0xfa   : > { %v612_v29 = vrot.slane %v611_v28, 2 }
  0xfc   : > { %v613_v30 = vadd.f32 %v612_v29, %v611_v28 }
  0xfe   : > { %v614_v31 = vrot.slane %v613_v30, 1 }
 0x100   : > { %v615_v34 = vadd.f32 %v614_v31, %v613_v30 }
 0x1a3   : > { %v798_v36 = vpop.f32.mrf.mxu1 }
 0x1a4   : > { %v799_v37 = vadd.f32 %v798_v36, %v725_v35  ;;  %v616_v35 = vmul.f32 0.0625, %v615_v34 }
 0x1a5   : > { %v1711_v38 = vpop.f32.mrf.mxu1 }
 0x1a6   : > { %v1605_v39 = vmul.f32 -1.442695, %v799_v37  ;;  %v617_v36 = vadd.f32 1e-05, %v616_v35  ;;  %v1152_v37 = vld [vmem:[%s2058_s30 + $0x20] sm:$0xff]  ;;  %v1062_v38 = vld [vmem:[%s2411_s4 + $0x28] sm:$0xff] }
 0x1a8   : > { %1896 = vpow2.f32 %v1605_v39  ;;  %v1151_v39 = vld [vmem:[%s2058_s30 + $0x18] sm:$0xff] }
 0x1b5   : > { %v1897_v40 = vpop.eup %1896 }
 0x1b6   : > { %v807_v41 = vadd.f32 1.0, %v1897_v40 }
 0x1b8   : > { %1898 = vrcp.f32 %v807_v41  ;;  %v1061_v41 = vld [vmem:[%s2411_s4 + $0x20] sm:$0xff] }
 0x1c5   : > { %v1899_v44 = vpop.eup %1898 }
 0x1c6   : > { %v810_v45 = vmul.f32 %v1899_v44, %v803_v43  ;;  %v1060_v44 = vld [vmem:[%s2411_s4 + $0x18] sm:$0xff] }
 0x1c8   : > { %v2177_v46 = vadd.f32 %v810_v45, %v802_v42  ;;  %v1150_v42 = vld [vmem:[%s2058_s30 + $0x10] sm:$0xff]  ;;  %v1149_v45 = vld [vmem:[%s2058_s30 + $0x8] sm:$0xff] }
 0x1ca   : > { %1745 = vmatmul.mubr.f32.vlgmr.msra.gmra.mxu0 %v2177_v46 }
 0x1cb   : > { %1797 = vmatpush3.msra.mxu0 %v1163_v49  ;;  %v624_v49 = vstv %s623_s26 }
 0x1cc   : > { %1798 = vmatprep.subr.mxu0 %v1162_v50  ;;  %vm2273_vm5 = vcmp.eq.s32.totalorder %v624_v49, 1 }
 0x1cd   : > { %1799 = vmatpush3.msra.mxu0 %v1162_v50  ;;  %v1059_v50 = vld [vmem:[%s2411_s4 + $0x10] sm:$0xff] }
 0x1ce   : > { %1800 = vmatprep.subr.mxu0 %v1161_v51 }
 0x1cf   : > { %1801 = vmatpush3.msra.mxu0 %v1161_v51  ;;  %v1148_v51 = vld [vmem:[%s2058_s30] sm:$0xff] }
 0x1d0   : > { %1802 = vmatprep.subr.mxu0 %v1160_v52 }
 0x1d1   : > { %1803 = vmatpush3.msra.mxu0 %v1160_v52 }
 0x1d2   : > { %1804 = vmatprep.subr.mxu0 %v1159_v53 }
 0x1d3   : > { %1805 = vmatpush3.msra.mxu0 %v1159_v53 }
 0x1d4   : > { %1806 = vmatprep.subr.mxu0 %v1158_v54 }
 0x1d5   : > { %1807 = vmatpush3.msra.mxu0 %v1158_v54 }
 0x1d6   : > { %1808 = vmatprep.subr.mxu0 %v1157_v55 }
 0x1d7   : > { %1809 = vmatpush3.msra.mxu0 %v1157_v55  ;;  %v1058_v55 = vld [vmem:[%s2411_s4 + $0x8] sm:$0xff] }
 0x1d8   : > { %1810 = vmatprep.subr.mxu0 %v1156_v56 }
 0x1d9   : > { %1811 = vmatpush3.msra.mxu0 %v1156_v56 }
 0x1da   : > { %1812 = vmatprep.subr.mxu0 %v1155_v57 }
 0x1db   : > { %1813 = vmatpush3.msra.mxu0 %v1155_v57  ;;  %v1057_v57 = vld [vmem:[%s2411_s4] sm:$0xff] }
 0x1dc   : > { %1814 = vmatprep.subr.mxu0 %v1154_v58 }
 0x1dd   : > { %1815 = vmatpush3.msra.mxu0 %v1154_v58 }
 0x1de   : > { %1816 = vmatprep.subr.mxu0 %v1153_v59 }
 0x1df   : > { %1817 = vmatpush3.msra.mxu0 %v1153_v59 }
 0x1e0   : > { %1818 = vmatprep.subr.mxu0 %v1152_v37 }
 0x1e1   : > { %1819 = vmatpush3.msra.mxu0 %v1152_v37 }
 0x1e2   : > { %1820 = vmatprep.subr.mxu0 %v1151_v39 }
 0x1e3   : > { %1821 = vmatpush3.msra.mxu0 %v1151_v39 }
 0x1e4   : > { %1822 = vmatprep.subr.mxu0 %v1150_v42 }
 0x1e5   : > { %1823 = vmatpush3.msra.mxu0 %v1150_v42 }
 0x1e6   : > { %1824 = vmatprep.subr.mxu0 %v1149_v45 }
 0x1e7   : > { %1825 = vmatpush3.msra.mxu0 %v1149_v45 }
 0x1e8   : > { %1826 = vmatprep.subr.mxu0 %v1148_v51 }
 0x1e9   : > { %1827 = vmatpush3.msra.mxu0 %v1148_v51 }
 0x28a   : > { %v896_v60 = vpop.f32.mrf.mxu0 }
 0x28b   : > { %1900 = vrsqrt.f32 %v896_v60  ;;  %vm900_vm4 = vcmp.gt.f32.partialorder %v896_v60, 0.0 }
 0x28c   : > { %v1746_v61 = vpop.f32.mrf.mxu0  ;;  %1902 = vrsqrt.f32 %v617_v36 }
 0x298   : > { %v1901_v62 = vpop.eup %1900 }
 0x299   : > { %v902_v0 = vsel %vm900_vm4, %v1901_v62, 0.0  ;;  %v1903_v40 = vpop.eup %1902 }
 0x29a   : > { %1752 = vmatmul.mubr.msk.f32.vlgmr.msra.gmra.mxu1 %vm905_vm3, %v902_v0  ;;  %v619_v43 = vmul.f32 %v1903_v40, %v605_v22  ;;  %v620_v47 = vmul.f32 %v1903_v40, %v606_v23 }
 0x29b   : > { %1755 = vmatpush3.msra.mxu1 %v2202_v63  ;;  %1758 = vmatprep.mubr.msk.f32.mxu1 %vm1944_vm2, %v1943_v4 }
 0x29c   : > { %1756 = vmatprep.subr.mxu1 %v1943_v4  ;;  %v1069_v4 = vld [vmem:[%s2411_s4 + $0x60] sm:$0xff]  ;;  %v621_v48 = vmax.f32 %v619_v43, 0.0  ;;  %v622_v53 = vmax.f32 %v620_v47, 0.0 }
 0x29d   : > { %1757 = vmatpush3.msra.mxu1 %v2208_v1 }
 0x29e   : > { %1759 = vmatmul.mubr.msk.f32.vlgmr.msra.gmra.mxu1 %vm905_vm3, %v902_v0  ;;  %1761 = vmatprep.subr.mxu1 %v1072_v2  ;;  %v626_v54 = vsel %vm2273_vm5, %v2237_v9, %v621_v48  ;;  %v627_v56 = vsel %vm2273_vm5, %v2239_v10, %v622_v53 }
 0x29f   : > { %1762 = vmatpush3.msra.mxu1 %v1072_v2  ;;  %1828 = vmatprep.mubr.f32.mxu0 %v626_v54 }
 0x2a0   : > { %1763 = vmatprep.subr.mxu1 %v1071_v3  ;;  %1829 = vmatmul.mubr.f32.vlgmr.msra.gmra.mxu0 %v627_v56 }
 0x2a1   : > { %1764 = vmatpush3.msra.mxu1 %v1071_v3 }
 0x2a2   : > { %1765 = vmatprep.subr.mxu1 %v1070_v5 }
 0x2a3   : > { %1766 = vmatpush3.msra.mxu1 %v1070_v5 }
 0x2a4   : > { %1767 = vmatprep.subr.mxu1 %v1069_v4 }
 0x2a5   : > { %1768 = vmatpush3.msra.mxu1 %v1069_v4 }
 0x2a6   : > { %1769 = vmatprep.subr.mxu1 %v1068_v6 }
 0x2a7   : > { %1770 = vmatpush3.msra.mxu1 %v1068_v6 }
 0x2a8   : > { %1771 = vmatprep.subr.mxu1 %v1067_v7 }
 0x2a9   : > { %1772 = vmatpush3.msra.mxu1 %v1067_v7 }
 0x2aa   : > { %1773 = vmatprep.subr.mxu1 %v1066_v8 }
 0x2ab   : > { %1774 = vmatpush3.msra.mxu1 %v1066_v8 }
 0x2ac   : > { %1775 = vmatprep.subr.mxu1 %v1065_v12 }
 0x2ad   : > { %1776 = vmatpush3.msra.mxu1 %v1065_v12 }
 0x2ae   : > { %1777 = vmatprep.subr.mxu1 %v1064_v14 }
 0x2af   : > { %1778 = vmatpush3.msra.mxu1 %v1064_v14 }
 0x2b0   : > { %1779 = vmatprep.subr.mxu1 %v1063_v16 }
 0x2b1   : > { %1780 = vmatpush3.msra.mxu1 %v1063_v16 }
 0x2b2   : > { %1781 = vmatprep.subr.mxu1 %v1062_v38 }
 0x2b3   : > { %1782 = vmatpush3.msra.mxu1 %v1062_v38 }
 0x2b4   : > { %1783 = vmatprep.subr.mxu1 %v1061_v41 }
 0x2b5   : > { %1784 = vmatpush3.msra.mxu1 %v1061_v41 }
 0x2b6   : > { %1785 = vmatprep.subr.mxu1 %v1060_v44 }
 0x2b7   : > { %1786 = vmatpush3.msra.mxu1 %v1060_v44 }
 0x2b8   : > { %1787 = vmatprep.subr.mxu1 %v1059_v50 }
 0x2b9   : > { %1788 = vmatpush3.msra.mxu1 %v1059_v50 }
 0x2ba   : > { %1789 = vmatprep.subr.mxu1 %v1058_v55 }
 0x2bb   : > { %1790 = vmatpush3.msra.mxu1 %v1058_v55 }
 0x2bc   : > { %1791 = vmatprep.subr.mxu1 %v1057_v57 }
 0x2bd   : > { %1792 = vmatpush3.msra.mxu1 %v1057_v57 }
 0x35a   : > { %v975_v58 = vpop.f32.mrf.mxu1 }
 0x35b   : > { %v1049_v60 = vmul.f32 %v975_v58, %v2177_v46 }
 0x35c   : > { %v1753_v59 = vpop.f32.mrf.mxu1 }
 0x35e   : > { %v1045_v61 = vpop.f32.mrf.mxu1 }
 0x35f   : > { %v1050_v62 = vmul.f32 %v1049_v60, %v1045_v61 }
 0x360   : > { %v1760_v0 = vpop.f32.mrf.mxu1  ;;  %v1830_v4 = vpop.f32.mrf.mxu0 }
 0x361   : > { %v1054_v2 = vrot.slane %v1050_v62, %v724_v33  ;;  %1831 = vmatprep.subr.mxu1 %v1830_v4  ;;  %v1333_v33 = vstv %s1332_s21 }
 0x362   : > { %v1230_v6 = vpop.f32.mrf.mxu0  ;;  %vm2302_vm6 = vcmp.eq.s32.totalorder %v1333_v33, 1 }
 0x363   : > { %v1056_v3 = vmul.f32 %v1054_v2, %v2202_v63  ;;  %v1055_v5 = vmul.f32 %v1054_v2, %v2208_v1  ;;  %v1328_v1 = vld [vmem:[#allocation3] sm:$0xff] }
 0x365   : > { %1793 = vmatprep.mubr.f32.mxu1 %v1055_v5 }
 0x366   : > { %1794 = vmatmul.mubr.f32.vlgmr.msra.gmra.mxu1 %v1056_v3 }
 0x367   : > { %1832 = vmatpush3.msra.mxu1 %v1830_v4 }
 0x368   : > { %1833 = vmatprep.subr.mxu1 %v1230_v6 }
 0x369   : > { %1834 = vmatpush3.msra.mxu1 %v1230_v6 }
 0x426   : > { %v1795_v46 = vpop.f32.mrf.mxu1 }
 0x428   : > { %v1139_v7 = vpop.f32.mrf.mxu1 }
 0x429   : > { %1835 = vmatprep.mubr.msk.f32.mxu1 %vm905_vm3, %v1139_v7 }
 0x42a   : > { %1836 = vmatmul.mubr.msk.f32.vlgmr.msra.gmra.mxu1 %vm905_vm3, %v1795_v46 }
 0x4ea   : > { %v1837_v63 = vpop.f32.mrf.mxu1 }
 0x4eb   : > { %v1324_v8 = vadd.f32 %v1837_v63, %v1608_v32 }
 0x4ec   : > { %v1318_v10 = vpop.f32.mrf.mxu1 }
 0x4ed   : > { %v1331_v12 = vadd.f32 %v1328_v1, %v1324_v8  ;;  %v1319_v13 = vadd.f32 %v1608_v32, %v1318_v10 }
 0x4ef   : > { %v2308_v14 = vsel %vm2302_vm6, %v1331_v12, %v1324_v8  ;;  %v1330_v15 = vadd.f32 %v1327_v11, %v1319_v13 }
 0x4f0   : > { %v1338_v16 = vadd.f32 %v2308_v14, %v1328_v1  ;;  %1344 = vst [vmem:[#allocation2 + $0x8] sm:$0xff] %v2308_v14 }
 0x4f1   : > { %v2314_v17 = vsel %vm2302_vm6, %v1330_v15, %v1319_v13 }
 0x4f2   : > { %v1340_v18 = vsel %vm2302_vm6, %v1338_v16, %v1328_v1  ;;  %v1337_v19 = vadd.f32 %v2314_v17, %v1327_v11  ;;  %1343 = vst [vmem:[#allocation2] sm:$0xff] %v2314_v17  ;;  %1350 = sbr.rel (%p1611_p7) target bundleno = 1614 (0x64e), region = 92 }
 0x4f3   : > { %v1342_v20 = vsel %vm2273_vm5, %v1324_v8, %v1340_v18 }
 0x4f4   : > { %1346 = vst [vmem:[#allocation3] sm:$0xff] %v1342_v20  ;;  %v1339_v21 = vsel %vm2302_vm6, %v1337_v19, %v1327_v11 }
 0x4f5   : > { %v1341_v22 = vsel %vm2273_vm5, %v1319_v13, %v1339_v21 }
 0x4f6   : > { %1345 = vst [vmem:[#allocation3 + $0x8] sm:$0xff] %v1341_v22 }
 0x4f7   : > { %v1355_v23 = vld [vmem:[%s2440_s7 + $0x10] sm:$0xff]  ;;  %v1353_v24 = vld [vmem:[%s2440_s7] sm:$0xff]  ;;  %v1946_v25 = vmov 0   ;;  %v1410_v26 = vld [vmem:[%s2441_s17 + $0x78] sm:$0xff]  ;;  %v1947_v29 = vmov 0.0   ;;  %vm1948_vm7 = vmmov 0  }
 0x4f8   : > { %1905 = vset.pattern.permute.xlu1 %v1946_v25  ;;  %1904 = vset.pattern.permute.xlu0 %v1946_v25  ;;  %v1356_v27 = vld [vmem:[%s2440_s7 + $0x18] sm:$0xff]  ;;  %v1354_v28 = vld [vmem:[%s2440_s7 + $0x8] sm:$0xff]  ;;  %v1409_v30 = vld [vmem:[%s2441_s17 + $0x70] sm:$0xff]  ;;  %v1351_v50 = vmax.f32 %v2314_v17, 0.0  ;;  %v1352_v51 = vmax.f32 %v2308_v14, 0.0  ;;  %vm1420_vm8 = vcmask 1041409  }
 0x4f9   : > { %1369 = vperm.xlu1 %1905, %v1355_v23   ;;  %1359 = vperm.xlu0 %1904, %v1353_v24   ;;  %v1408_v31 = vld [vmem:[%s2441_s17 + $0x68] sm:$0xff]  ;;  %v1407_v34 = vld [vmem:[%s2441_s17 + $0x60] sm:$0xff]  ;;  %v1406_v35 = vld [vmem:[%s2441_s17 + $0x58] sm:$0xff]  ;;  %vm1493_vm9 = vcmask 17408  }
 0x4fa   : > { %1838 = vmatprep.subr.mxu0 %v1947_v29  ;;  %v1405_v36 = vld [vmem:[%s2441_s17 + $0x50] sm:$0xff]  ;;  %1870 = vmatprep.mubr.msk.f32.mxu0 %vm1948_vm7, %v1947_v29  ;;  %v1404_v37 = vld [vmem:[%s2441_s17 + $0x48] sm:$0xff]  ;;  %v1403_v38 = vld [vmem:[%s2441_s17 + $0x40] sm:$0xff] }
 0x4fb   : > { %1839 = vmatpush3.msra.mxu0 %v1410_v26  ;;  %v1402_v39 = vld [vmem:[%s2441_s17 + $0x38] sm:$0xff]  ;;  %v1401_v40 = vld [vmem:[%s2441_s17 + $0x30] sm:$0xff]  ;;  %v1400_v41 = vld [vmem:[%s2441_s17 + $0x28] sm:$0xff] }
 0x4fc   : > { %1840 = vmatprep.subr.mxu0 %v1947_v29  ;;  %v1399_v42 = vld [vmem:[%s2441_s17 + $0x20] sm:$0xff]  ;;  %v1398_v43 = vld [vmem:[%s2441_s17 + $0x18] sm:$0xff]  ;;  %v1397_v44 = vld [vmem:[%s2441_s17 + $0x10] sm:$0xff] }
 0x4fd   : > { %1374 = vperm.xlu1 %1905, %v1356_v27   ;;  %1364 = vperm.xlu0 %1904, %v1354_v28   ;;  %v1396_v45 = vld [vmem:[%s2441_s17 + $0x8] sm:$0xff]  ;;  %v1395_v47 = vld [vmem:[%s2441_s17] sm:$0xff] }
 0x4fe   : > { %1841 = vmatpush3.msra.mxu0 %v1409_v30  ;;  %v1612_v63 = vld [vmem:[%s2442_s27] ss:$0 sm:$0xff] }
 0x4ff   : > { %1842 = vmatprep.subr.mxu0 %v1947_v29 }
 0x500   : > { %1843 = vmatpush3.msra.mxu0 %v1408_v31 }
 0x501   : > { %1844 = vmatprep.subr.mxu0 %v1947_v29 }
 0x502   : > { %1845 = vmatpush3.msra.mxu0 %v1407_v34 }
 0x503   : > { %1846 = vmatprep.subr.mxu0 %v1947_v29 }
 0x504   : > { %1847 = vmatpush3.msra.mxu0 %v1406_v35 }
 0x505   : > { %1848 = vmatprep.subr.mxu0 %v1947_v29 }
 0x506   : > { %1849 = vmatpush3.msra.mxu0 %v1405_v36 }
 0x507   : > { %1850 = vmatprep.subr.mxu0 %v1947_v29 }
 0x508   : > { %1851 = vmatpush3.msra.mxu0 %v1404_v37 }
 0x509   : > { %1852 = vmatprep.subr.mxu0 %v1947_v29 }
 0x50a   : > { %1853 = vmatpush3.msra.mxu0 %v1403_v38 }
 0x50b   : > { %1854 = vmatprep.subr.mxu0 %v1947_v29 }
 0x50c   : > { %1855 = vmatpush3.msra.mxu0 %v1402_v39 }
 0x50d   : > { %1856 = vmatprep.subr.mxu0 %v1947_v29 }
 0x50e   : > { %1857 = vmatpush3.msra.mxu0 %v1401_v40 }
 0x50f   : > { %1858 = vmatprep.subr.mxu0 %v1947_v29 }
 0x510   : > { %1859 = vmatpush3.msra.mxu0 %v1400_v41 }
 0x511   : > { %1860 = vmatprep.subr.mxu0 %v1947_v29 }
 0x512   : > { %1861 = vmatpush3.msra.mxu0 %v1399_v42 }
 0x513   : > { %1862 = vmatprep.subr.mxu0 %v1947_v29 }
 0x514   : > { %1863 = vmatpush3.msra.mxu0 %v1398_v43 }
 0x515   : > { %1864 = vmatprep.subr.mxu0 %v1947_v29 }
 0x516   : > { %1865 = vmatpush3.msra.mxu0 %v1397_v44 }
 0x517   : > { %1866 = vmatprep.subr.mxu0 %v1947_v29 }
 0x518   : > { %1867 = vmatpush3.msra.mxu0 %v1396_v45 }
 0x519   : > { %1868 = vmatprep.subr.mxu0 %v1947_v29 }
 0x51a   : > { %1869 = vmatpush3.msra.mxu0 %v1395_v47 }
 0x574   : > { %v1370_v48 = vpop.permute.xlu1 %1369  ;;  %v1360_v49 = vpop.permute.xlu0 %1359 }
 0x575   : > { %v1379_v54 = vmul.f32 %v1370_v48, %v1351_v50  ;;  %v1377_v55 = vmul.f32 %v1360_v49, %v1351_v50 }
 0x578   : > { %v1375_v52 = vpop.permute.xlu1 %1374  ;;  %v1365_v53 = vpop.permute.xlu0 %1364 }
 0x579   : > { %v1380_v56 = vmul.f32 %v1375_v52, %v1352_v51  ;;  %v1378_v57 = vmul.f32 %v1365_v53, %v1352_v51 }
 0x57b   : > { %v1388_v58 = vmax.f32 %v1379_v54, %v1380_v56  ;;  %v1381_v59 = vmax.f32 %v1377_v55, %v1378_v57 }
 0x57d   : > { %v1389_v60 = vrot.slane %v1388_v58, 4  ;;  %v1382_v61 = vrot.slane %v1381_v59, 4 }
 0x57f   : > { %v1390_v62 = vmax.f32 %v1388_v58, %v1389_v60  ;;  %v1383_v0 = vmax.f32 %v1381_v59, %v1382_v61 }
 0x581   : > { %v1391_v2 = vrot.slane %v1390_v62, 2  ;;  %v1384_v3 = vrot.slane %v1383_v0, 2 }
 0x583   : > { %v1392_v5 = vmax.f32 %v1390_v62, %v1391_v2  ;;  %v1385_v4 = vmax.f32 %v1383_v0, %v1384_v3 }
 0x585   : > { %v1386_v6 = vrot.slane %v1385_v4, 1  ;;  %v1393_v46 = vrot.slane %v1392_v5, 1 }
 0x587   : > { %v1387_v7 = vmax.f32 %v1385_v4, %v1386_v6  ;;  %v1394_v32 = vmax.f32 %v1392_v5, %v1393_v46 }
 0x589   : > { %v1421_v33 = vsel %vm1420_vm8, %v1394_v32, %v1387_v7 }
 0x58a   : > { %1871 = vmatmul.mubr.f32.vlgmr.msra.gmra.mxu0 %v1421_v33 }
 0x64a   : > { %v1489_v1 = vpop.f32.mrf.mxu0 }
 0x64b   : > { %v1490_v8 = vadd.f32 %v1612_v63, %v1489_v1 }
 0x64c   : > { %v1872_v9 = vpop.f32.mrf.mxu0 }
 0x64d   : > { %1494 = vst.msk [vmem:[#allocation4] sm:$0x3] %vm1493_vm9, %v1490_v8 }
 0x64e PF: > { %p1877_p8 = scmp.eq.s32.totalorder %s2041_s22, 6  ;;  %s1949_s0 = smov [#allocation4]  }
 0x64f   : > { %s1502_s19 = sshll.u32 %s1949_s0, 4  ;;  %s1503_s19 = int_to_ptr.vmem [resolvable:$true] %s1502_s19 }
 0x650   : > { %s1906_s23 = scalar_lea.vmem %s1503_s19, 32  ;;  %p1913_p12 = scmp.lt.s32.totalorder %s1503_s19, %s1503_s19 }
 0x651   : > { %p1907_p9 = scmp.ne.s32.totalorder %s1503_s19, %s1906_s23  ;;  %p1914_p13 = scmp.lt.s32.totalorder %s1906_s23, %s1906_s23 }
 0x653   : > { %p1908_p10 = pnand %p1907_p9, %p1877_p8  ;;  %p1915_p0 = por %p1914_p13, %p1913_p12 }
 0x655   : > { %p1909_p11 = pneg %p1908_p10 }
 0x657   : > { %p1916_p1 = pnand %p1915_p0, %p1909_p11 }
 0x659   : > { %1919 = shalt.err (!%p1916_p1)
}
 0x65a   : > { %s2443_s26 = sld [smem:[#allocation12_spill]] }
 0x660   : > { %1874 = dma.vmem_to_hbm [thread:$0]  (%p1877_p8), %s1503_s19, 32, %s2443_s26, [#allocation5]  }
 0x661   : > { %1935 = dma.done.wait (%p1877_p8), [#allocation5], 32  }
 0x662   : > { %1937 = vsyncadd (%p1877_p8), [#allocation5], 4294967264 }
 0x663 PF: > { %s2444_s24 = sld [smem:[#allocation7_spill]] }
 0x669   : > { %s27_s21 = sadd.s32 1, %s2444_s24  }
 0x66a   : > { %p24_p2 = scmp.ge.s32.totalorder %s27_s21, 9  }
 0x66c   :  { %26 = sbr.rel (!%p24_p2) target bundleno = 7 (0x7), region = 134 }
 0x671   :  { %1515 = vsyncpa [#allocation5], 1 }
 0x672   :  { %1517 = vsyncpa [#allocation5 + $0x1], 1 }

</bundles_post_ra>
